<compile_context>
chip_gen: v7x
topology: tpu7x:2x2x1
jax: 0.10.0
libtpu: 0.0.40
codegen_flags: <defaults>
</compile_context>

<pallas_src>
import numpy as np
import jax
import jax.numpy as jnp
from jax import lax
from jax.experimental import pallas as pl
from jax.experimental.pallas import tpu as pltpu


# ---------------------------------------------------------------------------
# helpers
# ---------------------------------------------------------------------------
def _row_split(num_types, num_neurons):
    # torch slicing quirk:
    #   input  rows = [:n0]      -> n0 rows             (if n0 != 0)
    #   inter  rows = [n0:n1]    -> max(0, n1-n0) rows  (if n1 != 0)
    #   output rows = [n0+n1:]   -> N - n0 - n1 rows    (if n2 != 0)
    n0, n1, n2 = num_types
    N = num_neurons
    r0 = n0
    r1 = max(0, n1 - n0) if n1 != 0 else 0
    r2 = max(0, N - (n0 + n1)) if n2 != 0 else 0
    return r0, r1, r2


def _round_up(x, m):
    return ((x + m - 1) // m) * m


def _pick_tb(B, flat_width):
    """Largest divisor of B whose double-buffered (input + output) blocks plus the
    resident base/cw rows stay within ~24 MiB, targeting >= ~2 MiB output blocks,
    while keeping grid >= 2 when B allows it (v7x has 2 TensorCores)."""
    row_bytes = 4 * flat_width
    target_block = 2 << 20
    vmem_budget = 24 << 20
    divs = [d for d in range(1, B + 1) if B % d == 0]
    cands = [d for d in divs if d <= max(1, B // 2)] or [1]
    tb = cands[0]
    for d in cands:
        vmem = 4 * d * row_bytes + 4 * row_bytes   # 2x dbl-buffered (inp, out) + base/cw
        if vmem > vmem_budget:
            break
        tb = d
        if d * row_bytes >= target_block:
            break
    return tb


# ---------------------------------------------------------------------------
# Kernel 1: batch-invariant part (runs exactly once)
# ---------------------------------------------------------------------------
def make_base_kernel(num_types, num_neurons, hidden_size, hp):
    n0, n1, n2 = num_types
    N, H, HP = num_neurons, hidden_size, hp
    r0, r1, r2 = _row_split(num_types, N)
    n_out = r0 + r1 + r2

    def kernel(hs_ref, adj_ref, wqkv_ref, wt_ref, bt_ref, wu_ref, bu_ref, wu0i_ref,
               base_ref, cw_ref):
        hs = hs_ref[...]                    # (N, H)
        adj = adj_ref[...]                  # (N, N)

        # ---- AccumulatorFunction: masked attention (segments 128-lane aligned) ----
        qkv = jnp.dot(hs, wqkv_ref[...], preferred_element_type=jnp.float32)   # (N, 3*HP)
        q = qkv[:, 0:HP]
        k = qkv[:, HP:2 * HP]
        v = qkv[:, 2 * HP:3 * HP]
        # q @ k.T without an explicit transpose (contract last dims); zero-padded
        # columns contribute nothing.
        rel = lax.dot_general(q, k, (((1,), (1,)), ((), ())),
                              preferred_element_type=jnp.float32)              # (N, N)
        rel = adj * rel
        inv = lax.rsqrt(jnp.sum(rel * rel, axis=1, keepdims=True))             # 1/||row||, no eps (torch)
        rel = rel * inv
        acc = jnp.dot(rel, v, preferred_element_type=jnp.float32)              # (N, HP)

        # ---- fused per-type linears (wu/bu/wu0i pre-scaled by step_size) ----
        t_all = 2.0 * jax.nn.sigmoid(
            jnp.dot(hs, wt_ref[...], preferred_element_type=jnp.float32) + bt_ref[...]) - 1.0
        u_all = jnp.dot(acc, wu_ref[...], preferred_element_type=jnp.float32) + bu_ref[...]

        # ---- assemble batch-invariant output + type-0 input coefficient ----
        # (one-shot kernel: the sub-tile row stores here are off the hot path)
        if n0 != 0:
            t0 = t_all[:n0, 0:H]
            base_ref[0:r0, :] = hs[:n0] + t0 * u_all[:n0, 0:H]
            cw_ref[0:r0, :] = t0 * wu0i_ref[...]          # step*t0*Wu0_inp, broadcast (1,H)
        if n_out - r0 > 0:
            cw_ref[r0:, :] = jnp.zeros((n_out - r0, H), jnp.float32)
        if n1 != 0 and r1 > 0:
            base_ref[r0:r0 + r1, :] = (hs[n0:n1]
                                       + t_all[n0:n1, HP:HP + H] * u_all[n0:n1, HP:HP + H])
        if n2 != 0 and r2 > 0:
            base_ref[r0 + r1:, :] = (hs[n0 + n1:]
                                     + t_all[n0 + n1:, 2 * HP:2 * HP + H]
                                     * u_all[n0 + n1:, 2 * HP:2 * HP + H])

    return kernel, n_out


# ---------------------------------------------------------------------------
# Kernel 2: per-batch hot path — one lane-dense FMA
# ---------------------------------------------------------------------------
def batch_kernel(base_ref, cw_ref, inp_ref, out_ref):
    # out = base + cw * inp over a flattened (tb, n_out*H) block: single unmasked store.
    out_ref[...] = base_ref[...] + cw_ref[...] * inp_ref[...]


# ---------------------------------------------------------------------------
# Wrapper (weight packing, BlockSpecs, pallas_calls)
# ---------------------------------------------------------------------------
def dynamic_attention_forward(params, input_states):
    """Mimics DynamicAttentionNetwork.forward(input_states) with 2-D input_states
    and hidden_states=None (BasicHiddenStateInitializer path)."""
    B = input_states.shape[0]
    N, H = params["initial_hidden_states"].shape
    n0, n1, n2 = params["num_types"]
    r0, r1, r2 = _row_split((n0, n1, n2), N)
    n_out = r0 + r1 + r2
    HP = _round_up(H, 128)                      # 128-lane-aligned segment width
    step = params["step_size"][0, 0]

    def g(name, shape):
        return params[name] if name in params else jnp.zeros(shape, jnp.float32)

    def pad_cols(w):
        return jnp.pad(w, ((0, 0), (0, HP - w.shape[1])))

    def pad_rows_cols(w):
        return jnp.pad(w, ((0, HP - w.shape[0]), (0, HP - w.shape[1])))

    # ---- pack weights: fewer DMAs, lane-denser MXU ops, aligned column slices ----
    wqkv = jnp.concatenate([pad_cols(params["wq"]), pad_cols(params["wk"]),
                            pad_cols(params["wv"])], axis=1)                      # (H, 3*HP)
    wt_all = jnp.concatenate([pad_cols(g("wt0", (H, H))), pad_cols(g("wt1", (H, H))),
                              pad_cols(g("wt2", (H, H)))], axis=1)                # (H, 3*HP)
    bt_all = jnp.concatenate([pad_cols(g("bt0", (1, H))), pad_cols(g("bt1", (1, H))),
                              pad_cols(g("bt2", (1, H)))], axis=1)                # (1, 3*HP)
    # fold step_size into the state-update path (removes SMEM scalar + per-element mul)
    wu_all = step * jnp.concatenate([pad_rows_cols(g("wu0_acc", (H, H))),
                                     pad_rows_cols(g("wu1", (H, H))),
                                     pad_rows_cols(g("wu2", (H, H)))], axis=1)    # (HP, 3*HP)
    bu_all = step * jnp.concatenate([pad_cols(g("bu0", (1, H))), pad_cols(g("bu1", (1, H))),
                                     pad_cols(g("bu2", (1, H)))], axis=1)         # (1, 3*HP)
    wu0i = step * g("wu0_inp", (1, H))                                            # (1, H)

    base_kernel, _ = make_base_kernel((n0, n1, n2), N, H, HP)

    def full(shape):
        nd = len(shape)
        return pl.BlockSpec(shape, lambda i, _nd=nd: (0,) * _nd)

    # TODO(synk): for large N, tile the attention over query rows (grid over N/tq) instead
    # of holding the full (N,N) relevancies resident in VMEM (v7x has only 64 MiB).
    base, cw = pl.pallas_call(
        base_kernel,
        grid=(1,),
        in_specs=[
            full((N, H)),                               # initial hidden states
            full((N, N)),                               # adjacency mask (adjacency_matrix.T)
            full((H, 3 * HP)),                          # Wq|Wk|Wv
            full((H, 3 * HP)), full((1, 3 * HP)),       # time-step W, b
            full((HP, 3 * HP)), full((1, 3 * HP)),      # step-scaled state-update W, b
            full((1, H)),                               # step-scaled Wu0 input column
        ],
        out_specs=(full((n_out, H)), full((n_out, H))),
        out_shape=(jax.ShapeDtypeStruct((n_out, H), jnp.float32),
                   jax.ShapeDtypeStruct((n_out, H), jnp.float32)),
        compiler_params=pltpu.CompilerParams(
            dimension_semantics=("arbitrary",),
            vmem_limit_bytes=32 * 1024 * 1024),
        cost_estimate=pl.CostEstimate(
            flops=int(2 * N * (3 * HP) * (2 * H + HP) + 4 * N * N * HP),
            transcendentals=int(N * 3 * HP + N),
            bytes_accessed=int(4 * (N * H + N * N + (2 * H + HP + 2) * 3 * HP
                                    + H + 2 * n_out * H))),
    )(params["initial_hidden_states"], params["adj_mask"],
      wqkv, wt_all, bt_all, wu_all, bu_all, wu0i)

    if n0 == 0:
        # no input neurons: output is fully batch-invariant
        return jnp.broadcast_to(base[None], (B, n_out, H))

    # ---- per-batch streaming FMA over a lane-dense flattened layout ----
    F = n_out * H
    base_flat = base.reshape(1, F)
    cw_flat = cw.reshape(1, F)
    inp = input_states.astype(jnp.float32)                       # (B, n0)
    if n_out > n0:
        inp = jnp.pad(inp, ((0, 0), (0, n_out - n0)))            # zero where cw == 0
    inp_rep = jnp.repeat(inp, H, axis=1)                         # (B, F), lane-dense

    tb = _pick_tb(B, F)

    out_flat = pl.pallas_call(
        batch_kernel,
        grid=(B // tb,),
        in_specs=[
            pl.BlockSpec((1, F), lambda b: (0, 0)),              # base (batch-invariant)
            pl.BlockSpec((1, F), lambda b: (0, 0)),              # cw   (batch-invariant)
            pl.BlockSpec((tb, F), lambda b: (b, 0)),             # replicated input rows
        ],
        out_specs=pl.BlockSpec((tb, F), lambda b: (b, 0)),
        out_shape=jax.ShapeDtypeStruct((B, F), jnp.float32),
        compiler_params=pltpu.CompilerParams(
            dimension_semantics=("parallel",),
            vmem_limit_bytes=32 * 1024 * 1024),
        cost_estimate=pl.CostEstimate(
            flops=int(2 * B * F), transcendentals=0,
            bytes_accessed=int(4 * (2 * F + 2 * B * F))),
    )(base_flat, cw_flat, inp_rep)
    return out_flat.reshape(B, n_out, H)


# ---------------------------------------------------------------------------
# Pure-JAX reference (for a correctness check)
# ---------------------------------------------------------------------------
def reference_forward(params, input_states):
    B = input_states.shape[0]
    ihs = params["initial_hidden_states"]
    hs = jnp.broadcast_to(ihs[None], (B,) + ihs.shape)
    inp = input_states[:, :, None].astype(jnp.float32)
    n0, n1, n2 = params["num_types"]
    step = params["step_size"][0, 0]

    q = hs @ params["wq"]
    k = hs @ params["wk"]
    v = hs @ params["wv"]
    rel = q @ jnp.swapaxes(k, 1, 2)
    rel = params["adj_mask"][None] * rel
    rel = rel / jnp.linalg.norm(rel, axis=2, keepdims=True)
    acc = rel @ v

    def ts(x, w, b):
        return 2.0 * jax.nn.sigmoid(x @ w + b) - 1.0

    wu0_full = jnp.concatenate([params["wu0_acc"], params["wu0_inp"]], axis=0)
    out0 = hs[:, :n0] + step * ts(hs[:, :n0], params["wt0"], params["bt0"]) * (
        jnp.concatenate([acc[:, :n0], inp], axis=2) @ wu0_full + params["bu0"])
    out1 = hs[:, n0:n1] + step * ts(hs[:, n0:n1], params["wt1"], params["bt1"]) * (
        acc[:, n0:n1] @ params["wu1"] + params["bu1"])
    out2 = hs[:, n0 + n1:] + step * ts(hs[:, n0 + n1:], params["wt2"], params["bt2"]) * (
        acc[:, n0 + n1:] @ params["wu2"] + params["bu2"])
    return jnp.concatenate([out0, out1, out2], axis=1)


# ---------------------------------------------------------------------------
# Deterministic parameter initialization (synthetic, mirrors init_params)
# ---------------------------------------------------------------------------
def init_params(key, input_size, hidden_size, num_types, num_neurons):
    N, H, I = num_neurons, hidden_size, input_size
    keys = jax.random.split(key, 24)
    ki = iter(keys)

    def xavier(k, shape):
        fan_in, fan_out = shape
        limit = float(np.sqrt(6.0 / (fan_in + fan_out)))
        return jax.random.uniform(k, shape, jnp.float32, -limit, limit)

    def bias(k, fan_in, out):
        bound = float(1.0 / np.sqrt(fan_in))
        return jax.random.uniform(k, (1, out), jnp.float32, -bound, bound)

    # adjacency matrix (0/1), identity added so every row/column is non-empty
    adj = (jax.random.uniform(next(ki), (N, N)) < 0.5).astype(jnp.float32)
    adj = jnp.clip(adj + jnp.eye(N, dtype=jnp.float32), 0.0, 1.0)

    params = {
        "num_types": num_types,
        "adj_mask": adj.T,                                        # adjacency_matrix.T
        "step_size": jnp.full((1, 1), 0.01, jnp.float32),         # init_params constant
        "initial_hidden_states": xavier(next(ki), (N, H)),        # xavier (dim > 1 param)
        "wq": xavier(next(ki), (H, H)),
        "wk": xavier(next(ki), (H, H)),
        "wv": xavier(next(ki), (H, H)),
        # type 0: StateUpdateFunction(I+H -> H), time-step (H -> H)
        "wt0": xavier(next(ki), (H, H)), "bt0": bias(next(ki), H, H),
        "wu0_acc": xavier(next(ki), (H, H)),
        "wu0_inp": xavier(next(ki), (I, H)),
        "bu0": bias(next(ki), H + I, H),
        # type 1
        "wt1": xavier(next(ki), (H, H)), "bt1": bias(next(ki), H, H),
        "wu1": xavier(next(ki), (H, H)), "bu1": bias(next(ki), H, H),
        # type 2
        "wt2": xavier(next(ki), (H, H)), "bt2": bias(next(ki), H, H),
        "wu2": xavier(next(ki), (H, H)), "bu2": bias(next(ki), H, H),
    }
    return params


if __name__ == "__main__":
    # Small, shape-consistent configuration:
    #   N = 16 neurons, num_types = (4, 8, 4), hidden_state_size = 32, input_size = 1
    B, N, H, I = 2, 16, 32, 1
    num_types = (4, 8, 4)

    key = jax.random.PRNGKey(0)
    kp, kx = jax.random.split(key)
    params = init_params(kp, I, H, num_types, N)
    input_states = jax.random.normal(kx, (B, num_types[0]), jnp.float32)  # 2-D torch input path

    out = dynamic_attention_forward(params, input_states)
    out = jax.block_until_ready(out)

    ref = jax.block_until_ready(reference_forward(params, input_states))
    np.testing.assert_allclose(np.asarray(out), np.asarray(ref), rtol=1e-5, atol=1e-5)

    # TODO(synk): InputHiddenStateInitializer (conv) path and the
    # hidden_states/initial_output_mask/initial_outputs overrides are not exercised here.
    print("KERNEL_OK")
</pallas_src>

<mosaic_0001>
module attributes {stable_mosaic.version = 11 : i64} {
  func.func @kernel(%arg0: i32, %arg1: memref<16x32xf32, #tpu.memory_space<vmem>>, %arg2: memref<16x16xf32, #tpu.memory_space<vmem>>, %arg3: memref<32x384xf32, #tpu.memory_space<vmem>>, %arg4: memref<32x384xf32, #tpu.memory_space<vmem>>, %arg5: memref<1x384xf32, #tpu.memory_space<vmem>>, %arg6: memref<128x384xf32, #tpu.memory_space<vmem>>, %arg7: memref<1x384xf32, #tpu.memory_space<vmem>>, %arg8: memref<1x32xf32, #tpu.memory_space<vmem>>, %arg9: memref<12x32xf32, #tpu.memory_space<vmem>>, %arg10: memref<12x32xf32, #tpu.memory_space<vmem>>) attributes {dimension_semantics = [#tpu.dimension_semantics<arbitrary>], iteration_bounds = array<i64: 1>, scalar_prefetch = 0 : i64, scratch_operands = 0 : i64, tpu.core_type = #tpu.core_type<tc>, window_params = [{pipeline_mode = #tpu.pipeline_mode<synchronous>, transform_indices = @transform_0, window_bounds = array<i64: 16, 32>}, {pipeline_mode = #tpu.pipeline_mode<synchronous>, transform_indices = @transform_1, window_bounds = array<i64: 16, 16>}, {pipeline_mode = #tpu.pipeline_mode<synchronous>, transform_indices = @transform_2, window_bounds = array<i64: 32, 384>}, {pipeline_mode = #tpu.pipeline_mode<synchronous>, transform_indices = @transform_3, window_bounds = array<i64: 32, 384>}, {pipeline_mode = #tpu.pipeline_mode<synchronous>, transform_indices = @transform_4, window_bounds = array<i64: 1, 384>}, {pipeline_mode = #tpu.pipeline_mode<synchronous>, transform_indices = @transform_5, window_bounds = array<i64: 128, 384>}, {pipeline_mode = #tpu.pipeline_mode<synchronous>, transform_indices = @transform_6, window_bounds = array<i64: 1, 384>}, {pipeline_mode = #tpu.pipeline_mode<synchronous>, transform_indices = @transform_7, window_bounds = array<i64: 1, 32>}, {pipeline_mode = #tpu.pipeline_mode<synchronous>, transform_indices = @transform_8, window_bounds = array<i64: 12, 32>}, {pipeline_mode = #tpu.pipeline_mode<synchronous>, transform_indices = @transform_9, window_bounds = array<i64: 12, 32>}]} {
    %c0 = arith.constant 0 : index
    %c0_0 = arith.constant 0 : index
    %0 = vector.load %arg1[%c0, %c0_0] : memref<16x32xf32, #tpu.memory_space<vmem>>, vector<16x32xf32>
    %c0_1 = arith.constant 0 : index
    %c0_2 = arith.constant 0 : index
    %1 = vector.load %arg2[%c0_1, %c0_2] : memref<16x16xf32, #tpu.memory_space<vmem>>, vector<16x16xf32>
    %c0_3 = arith.constant 0 : index
    %c0_4 = arith.constant 0 : index
    %2 = vector.load %arg3[%c0_3, %c0_4] : memref<32x384xf32, #tpu.memory_space<vmem>>, vector<32x384xf32>
    %cst = arith.constant dense<0.000000e+00> : vector<16x384xf32>
    %3 = tpu.matmul %0, %2, %cst {dimension_numbers = #tpu.dot_dimension_numbers<[1], [0], [0], [1], [0, 0, 1, 1], [], []>} : vector<16x32xf32>, vector<32x384xf32>, vector<16x384xf32> -> vector<16x384xf32>
    %4 = vector.extract_strided_slice %3 {offsets = [0, 0], sizes = [16, 128], strides = [1, 1]} : vector<16x384xf32> to vector<16x128xf32>
    %5 = vector.extract_strided_slice %3 {offsets = [0, 128], sizes = [16, 128], strides = [1, 1]} : vector<16x384xf32> to vector<16x128xf32>
    %6 = vector.extract_strided_slice %3 {offsets = [0, 256], sizes = [16, 128], strides = [1, 1]} : vector<16x384xf32> to vector<16x128xf32>
    %cst_5 = arith.constant dense<0.000000e+00> : vector<16x16xf32>
    %7 = tpu.matmul %4, %5, %cst_5 {dimension_numbers = #tpu.dot_dimension_numbers<[1], [1], [0], [0], [0, 0, 1, 0], [], []>} : vector<16x128xf32>, vector<16x128xf32>, vector<16x16xf32> -> vector<16x16xf32>
    %8 = arith.mulf %1, %7 : vector<16x16xf32>
    %9 = arith.mulf %8, %8 : vector<16x16xf32>
    %cst_6 = arith.constant dense<0.000000e+00> : vector<16xf32>
    %10 = vector.multi_reduction <add>, %9, %cst_6 [1] : vector<16x16xf32> to vector<16xf32>
    %11 = vector.shape_cast %10 : vector<16xf32> to vector<16x1xf32>
    %12 = math.rsqrt %11 : vector<16x1xf32>
    %13 = vector.broadcast %12 : vector<16x1xf32> to vector<16x16xf32>
    %14 = arith.mulf %8, %13 : vector<16x16xf32>
    %cst_7 = arith.constant dense<0.000000e+00> : vector<16x128xf32>
    %15 = tpu.matmul %14, %6, %cst_7 {dimension_numbers = #tpu.dot_dimension_numbers<[1], [0], [0], [1], [0, 0, 1, 1], [], []>} : vector<16x16xf32>, vector<16x128xf32>, vector<16x128xf32> -> vector<16x128xf32>
    %c0_8 = arith.constant 0 : index
    %c0_9 = arith.constant 0 : index
    %16 = vector.load %arg4[%c0_8, %c0_9] : memref<32x384xf32, #tpu.memory_space<vmem>>, vector<32x384xf32>
    %cst_10 = arith.constant dense<0.000000e+00> : vector<16x384xf32>
    %17 = tpu.matmul %0, %16, %cst_10 {dimension_numbers = #tpu.dot_dimension_numbers<[1], [0], [0], [1], [0, 0, 1, 1], [], []>} : vector<16x32xf32>, vector<32x384xf32>, vector<16x384xf32> -> vector<16x384xf32>
    %c0_11 = arith.constant 0 : index
    %c0_12 = arith.constant 0 : index
    %18 = vector.load %arg5[%c0_11, %c0_12] : memref<1x384xf32, #tpu.memory_space<vmem>>, vector<1x384xf32>
    %19 = vector.broadcast %18 : vector<1x384xf32> to vector<16x384xf32>
    %20 = arith.addf %17, %19 : vector<16x384xf32>
    %21 = arith.negf %20 : vector<16x384xf32>
    %22 = math.exp %21 : vector<16x384xf32>
    %cst_13 = arith.constant 1.000000e+00 : f32
    %23 = vector.broadcast %cst_13 : f32 to vector<16x384xf32>
    %24 = arith.addf %23, %22 : vector<16x384xf32>
    %25 = arith.divf %23, %24 : vector<16x384xf32>
    %cst_14 = arith.constant 2.000000e+00 : f32
    %26 = vector.broadcast %cst_14 : f32 to vector<16x384xf32>
    %27 = arith.mulf %26, %25 : vector<16x384xf32>
    %cst_15 = arith.constant 1.000000e+00 : f32
    %28 = vector.broadcast %cst_15 : f32 to vector<16x384xf32>
    %29 = arith.subf %27, %28 : vector<16x384xf32>
    %c0_16 = arith.constant 0 : index
    %c0_17 = arith.constant 0 : index
    %30 = vector.load %arg6[%c0_16, %c0_17] : memref<128x384xf32, #tpu.memory_space<vmem>>, vector<128x384xf32>
    %cst_18 = arith.constant dense<0.000000e+00> : vector<16x384xf32>
    %31 = tpu.matmul %15, %30, %cst_18 {dimension_numbers = #tpu.dot_dimension_numbers<[1], [0], [0], [1], [0, 0, 1, 1], [], []>} : vector<16x128xf32>, vector<128x384xf32>, vector<16x384xf32> -> vector<16x384xf32>
    %c0_19 = arith.constant 0 : index
    %c0_20 = arith.constant 0 : index
    %32 = vector.load %arg7[%c0_19, %c0_20] : memref<1x384xf32, #tpu.memory_space<vmem>>, vector<1x384xf32>
    %33 = vector.broadcast %32 : vector<1x384xf32> to vector<16x384xf32>
    %34 = arith.addf %31, %33 : vector<16x384xf32>
    %35 = vector.extract_strided_slice %29 {offsets = [0, 0], sizes = [4, 32], strides = [1, 1]} : vector<16x384xf32> to vector<4x32xf32>
    %36 = vector.extract_strided_slice %0 {offsets = [0, 0], sizes = [4, 32], strides = [1, 1]} : vector<16x32xf32> to vector<4x32xf32>
    %37 = vector.extract_strided_slice %34 {offsets = [0, 0], sizes = [4, 32], strides = [1, 1]} : vector<16x384xf32> to vector<4x32xf32>
    %38 = arith.mulf %35, %37 : vector<4x32xf32>
    %39 = arith.addf %36, %38 : vector<4x32xf32>
    %c0_21 = arith.constant 0 : index
    %c0_22 = arith.constant 0 : index
    %40 = vector.load %arg9[%c0_21, %c0_22] : memref<12x32xf32, #tpu.memory_space<vmem>>, vector<4x32xf32>
    tpu.vector_store %arg9[%c0_21, %c0_22], %39 {strides = array<i32>} : memref<12x32xf32, #tpu.memory_space<vmem>>, vector<4x32xf32>,
    %c0_23 = arith.constant 0 : index
    %c0_24 = arith.constant 0 : index
    %41 = vector.load %arg8[%c0_23, %c0_24] : memref<1x32xf32, #tpu.memory_space<vmem>>, vector<1x32xf32>
    %42 = vector.broadcast %41 : vector<1x32xf32> to vector<4x32xf32>
    %43 = arith.mulf %35, %42 : vector<4x32xf32>
    %c0_25 = arith.constant 0 : index
    %c0_26 = arith.constant 0 : index
    %44 = vector.load %arg10[%c0_25, %c0_26] : memref<12x32xf32, #tpu.memory_space<vmem>>, vector<4x32xf32>
    tpu.vector_store %arg10[%c0_25, %c0_26], %43 {strides = array<i32>} : memref<12x32xf32, #tpu.memory_space<vmem>>, vector<4x32xf32>,
    %cst_27 = arith.constant 0.000000e+00 : f32
    %45 = vector.broadcast %cst_27 : f32 to vector<8x32xf32>
    %c4 = arith.constant 4 : index
    %c0_28 = arith.constant 0 : index
    %46 = vector.load %arg10[%c4, %c0_28] : memref<12x32xf32, #tpu.memory_space<vmem>>, vector<8x32xf32>
    tpu.vector_store %arg10[%c4, %c0_28], %45 {strides = array<i32>} : memref<12x32xf32, #tpu.memory_space<vmem>>, vector<8x32xf32>,
    %47 = vector.extract_strided_slice %0 {offsets = [4, 0], sizes = [4, 32], strides = [1, 1]} : vector<16x32xf32> to vector<4x32xf32>
    %48 = vector.extract_strided_slice %29 {offsets = [4, 128], sizes = [4, 32], strides = [1, 1]} : vector<16x384xf32> to vector<4x32xf32>
    %49 = vector.extract_strided_slice %34 {offsets = [4, 128], sizes = [4, 32], strides = [1, 1]} : vector<16x384xf32> to vector<4x32xf32>
    %50 = arith.mulf %48, %49 : vector<4x32xf32>
    %51 = arith.addf %47, %50 : vector<4x32xf32>
    %c4_29 = arith.constant 4 : index
    %c0_30 = arith.constant 0 : index
    %52 = vector.load %arg9[%c4_29, %c0_30] : memref<12x32xf32, #tpu.memory_space<vmem>>, vector<4x32xf32>
    tpu.vector_store %arg9[%c4_29, %c0_30], %51 {strides = array<i32>} : memref<12x32xf32, #tpu.memory_space<vmem>>, vector<4x32xf32>,
    %53 = vector.extract_strided_slice %0 {offsets = [12, 0], sizes = [4, 32], strides = [1, 1]} : vector<16x32xf32> to vector<4x32xf32>
    %54 = vector.extract_strided_slice %29 {offsets = [12, 256], sizes = [4, 32], strides = [1, 1]} : vector<16x384xf32> to vector<4x32xf32>
    %55 = vector.extract_strided_slice %34 {offsets = [12, 256], sizes = [4, 32], strides = [1, 1]} : vector<16x384xf32> to vector<4x32xf32>
    %56 = arith.mulf %54, %55 : vector<4x32xf32>
    %57 = arith.addf %53, %56 : vector<4x32xf32>
    %c8 = arith.constant 8 : index
    %c0_31 = arith.constant 0 : index
    %58 = vector.load %arg9[%c8, %c0_31] : memref<12x32xf32, #tpu.memory_space<vmem>>, vector<4x32xf32>
    tpu.vector_store %arg9[%c8, %c0_31], %57 {strides = array<i32>} : memref<12x32xf32, #tpu.memory_space<vmem>>, vector<4x32xf32>,
    return
  }
  func.func @transform_0(%arg0: i32) -> (i32, i32) {
    %c0_i32 = arith.constant 0 : i32
    %c0_i32_0 = arith.constant 0 : i32
    %c0_i32_1 = arith.constant 0 : i32
    return %c0_i32, %c0_i32_0 : i32, i32
  }
  func.func @transform_1(%arg0: i32) -> (i32, i32) {
    %c0_i32 = arith.constant 0 : i32
    %c0_i32_0 = arith.constant 0 : i32
    %c0_i32_1 = arith.constant 0 : i32
    return %c0_i32, %c0_i32_0 : i32, i32
  }
  func.func @transform_2(%arg0: i32) -> (i32, i32) {
    %c0_i32 = arith.constant 0 : i32
    %c0_i32_0 = arith.constant 0 : i32
    %c0_i32_1 = arith.constant 0 : i32
    return %c0_i32, %c0_i32_0 : i32, i32
  }
  func.func @transform_3(%arg0: i32) -> (i32, i32) {
    %c0_i32 = arith.constant 0 : i32
    %c0_i32_0 = arith.constant 0 : i32
    %c0_i32_1 = arith.constant 0 : i32
    return %c0_i32, %c0_i32_0 : i32, i32
  }
  func.func @transform_4(%arg0: i32) -> (i32, i32) {
    %c0_i32 = arith.constant 0 : i32
    %c0_i32_0 = arith.constant 0 : i32
    %c0_i32_1 = arith.constant 0 : i32
    return %c0_i32, %c0_i32_0 : i32, i32
  }
  func.func @transform_5(%arg0: i32) -> (i32, i32) {
    %c0_i32 = arith.constant 0 : i32
    %c0_i32_0 = arith.constant 0 : i32
    %c0_i32_1 = arith.constant 0 : i32
    return %c0_i32, %c0_i32_0 : i32, i32
  }
  func.func @transform_6(%arg0: i32) -> (i32, i32) {
    %c0_i32 = arith.constant 0 : i32
    %c0_i32_0 = arith.constant 0 : i32
    %c0_i32_1 = arith.constant 0 : i32
    return %c0_i32, %c0_i32_0 : i32, i32
  }
  func.func @transform_7(%arg0: i32) -> (i32, i32) {
    %c0_i32 = arith.constant 0 : i32
    %c0_i32_0 = arith.constant 0 : i32
    %c0_i32_1 = arith.constant 0 : i32
    return %c0_i32, %c0_i32_0 : i32, i32
  }
  func.func @transform_8(%arg0: i32) -> (i32, i32) {
    %c0_i32 = arith.constant 0 : i32
    %c0_i32_0 = arith.constant 0 : i32
    %c0_i32_1 = arith.constant 0 : i32
    return %c0_i32, %c0_i32_0 : i32, i32
  }
  func.func @transform_9(%arg0: i32) -> (i32, i32) {
    %c0_i32 = arith.constant 0 : i32
    %c0_i32_0 = arith.constant 0 : i32
    %c0_i32_1 = arith.constant 0 : i32
    return %c0_i32, %c0_i32_0 : i32, i32
  }
}

</mosaic_0001>

<bundles_post_ra>
// kernel: tpu_custom_call.1
= control target key start
LH: loop header
LB: loop body
LE: loop exit
PB: predicated region body
PF: predicated region fallthrough
CT: control target
= control target key end

     0   :  { %15 = vsyncpa [#allocation3], 0  ;;  %s1577_s0 = inlined_call_operand.hbm [shape: f32[16,32], index: 0, kind: input, shape index: {}]   ;;  %s1578_s1 = inlined_call_operand.hbm [shape: f32[16,16], index: 1, kind: input, shape index: {}]   ;;  %s1579_s2 = inlined_call_operand.hbm [shape: f32[32,384], index: 2, kind: input, shape index: {}]   ;;  %s1580_s3 = inlined_call_operand.hbm [shape: f32[32,384], index: 3, kind: input, shape index: {}]   ;;  %s1581_s4 = inlined_call_operand.vmem [shape: f32[1,384], index: 4, kind: input, shape index: {}]   ;;  %s1582_s5 = inlined_call_operand.hbm [shape: f32[128,384], index: 5, kind: input, shape index: {}]   ;;  %s1583_s6 = inlined_call_operand.vmem [shape: f32[1,384], index: 6, kind: input, shape index: {}]   ;;  %s1584_s7 = inlined_call_operand.vmem [shape: f32[1,32], index: 7, kind: input, shape index: {}]   ;;  %s1585_s8 = inlined_call_operand.hbm [shape: f32[12,32], index: 8, kind: output, shape index: {0}]   ;;  %s1586_s9 = inlined_call_operand.hbm [shape: f32[12,32], index: 9, kind: output, shape index: {1}]  }
   0x1   :  { %16 = vsyncpa [#allocation6], 0 }
   0x2   :  { %17 = vsyncpa [#allocation9], 0 }
   0x3   :  { %18 = vsyncpa [#allocation4], 0 }
   0x4   :  { %19 = vsyncpa [#allocation13], 0  ;;  %s1341_s30 = smov [#allocation5]   ;;  %s1177_s13 = scalar_lea.hbm %s1578_s1, 256 }
   0x5   :  { %s37_s10 = sshll.u32 %s1341_s30, 4  ;;  %p1178_p0 = scmp.ne.s32.totalorder %s1578_s1, %s1177_s13  ;;  %s38_s10 = int_to_ptr.vmem [resolvable:$true] %s37_s10 }
   0x6   :  { %p1181_p1 = scmp.lt.u32.totalorder %s1177_s13, %s1578_s1 }
   0x8   :  { %p1183_p2 = pnand %p1181_p1, %p1178_p0 }
   0xa   :  { %1186 = shalt.err (!%p1183_p2)
}
   0xb   :  { %s1187_s18 = scalar_lea.vmem %s38_s10, 256  ;;  %p1192_p4 = scmp.lt.s32.totalorder %s38_s10, %s38_s10 }
   0xc   :  { %p1188_p3 = scmp.ne.s32.totalorder %s38_s10, %s1187_s18  ;;  %p1193_p5 = scmp.lt.s32.totalorder %s1187_s18, %s1187_s18 }
   0xe   :  { %p1194_p6 = por %p1193_p5, %p1192_p4 }
  0x10   :  { %p1195_p7 = pnand %p1194_p6, %p1188_p3 }
  0x12   :  { %1198 = shalt.err (!%p1195_p7)
}
  0x13   :  { %s1342_s19 = smov 128   ;;  %s1343_s20 = smov 8  }
  0x14   :  { %43 = dma.hbm_to_vmem [thread:$0]  %s1578_s1, 256, %s38_s10, [#allocation6], %s1342_s19, %s1342_s19, %s1343_s20  }
  0x15   :  { %s1344_s23 = smov [#allocation8]   ;;  %s1345_s25 = smov [#allocation2]  }
  0x16   :  { %s61_s24 = sshll.u32 %s1344_s23, 4  ;;  %s25_s26 = sshll.u32 %s1345_s25, 4  ;;  %s62_s24 = int_to_ptr.vmem [resolvable:$true] %s61_s24  ;;  %s26_s26 = int_to_ptr.vmem [resolvable:$true] %s25_s26 }
  0x17   :  { %s1199_s29 = scalar_lea.hbm %s1580_s3, 1536 }
  0x18   :  { %p1200_p8 = scmp.ne.s32.totalorder %s1580_s3, %s1199_s29  ;;  %p1203_p9 = scmp.lt.u32.totalorder %s1199_s29, %s1580_s3 }
  0x1a   :  { %p1205_p10 = pnand %p1203_p9, %p1200_p8 }
  0x1c   :  { %1208 = shalt.err (!%p1205_p10)
}
  0x1d   :  { %s1209_s1 = scalar_lea.vmem %s62_s24, 1536  ;;  %p1214_p12 = scmp.lt.s32.totalorder %s62_s24, %s62_s24 }
  0x1e   :  { %p1210_p11 = scmp.ne.s32.totalorder %s62_s24, %s1209_s1  ;;  %p1215_p13 = scmp.lt.s32.totalorder %s1209_s1, %s1209_s1 }
  0x20   :  { %p1216_p0 = por %p1215_p13, %p1214_p12 }
  0x22   :  { %p1217_p1 = pnand %p1216_p0, %p1210_p11 }
  0x24   :  { %1220 = shalt.err (!%p1217_p1)
}
  0x25   :  { %s1346_s10 = smov 384   ;;  %s1347_s14 = smov 24  }
  0x26   :  { %67 = dma.hbm_to_vmem [thread:$0]  %s1580_s3, 1536, %s62_s24, [#allocation9], %s1346_s10, %s1346_s10, %s1347_s14  }
  0x27   :  { %s1221_s21 = scalar_lea.hbm %s1577_s0, 256 }
  0x28   :  { %p1222_p2 = scmp.ne.s32.totalorder %s1577_s0, %s1221_s21  ;;  %p1225_p3 = scmp.lt.u32.totalorder %s1221_s21, %s1577_s0 }
  0x2a   :  { %p1227_p4 = pnand %p1225_p3, %p1222_p2 }
  0x2c   :  { %1230 = shalt.err (!%p1227_p4)
}
  0x2d   :  { %s1231_s28 = scalar_lea.vmem %s26_s26, 256  ;;  %p1236_p6 = scmp.lt.s32.totalorder %s26_s26, %s26_s26 }
  0x2e   :  { %p1232_p5 = scmp.ne.s32.totalorder %s26_s26, %s1231_s28  ;;  %p1237_p7 = scmp.lt.s32.totalorder %s1231_s28, %s1231_s28 }
  0x30   :  { %p1238_p8 = por %p1237_p7, %p1236_p6 }
  0x32   :  { %p1239_p9 = pnand %p1238_p8, %p1232_p5 }
  0x34   :  { %1242 = shalt.err (!%p1239_p9)
}
  0x35   :  { %31 = dma.hbm_to_vmem [thread:$0]  %s1577_s0, 256, %s26_s26, [#allocation3], %s1342_s19, %s1342_s19, %s1343_s20  }
  0x36   :  { %s1348_s29 = smov [#allocation7]   ;;  %s1349_s11 = smov [#allocation10]  }
  0x37   :  { %s49_s30 = sshll.u32 %s1348_s29, 4  ;;  %s75_s12 = sshll.u32 %s1349_s11, 4  ;;  %s50_s30 = int_to_ptr.vmem [resolvable:$true] %s49_s30  ;;  %s76_s12 = int_to_ptr.vmem [resolvable:$true] %s75_s12 }
  0x38   :  { %s1243_s15 = scalar_lea.hbm %s1579_s2, 1536 }
  0x39   :  { %p1244_p10 = scmp.ne.s32.totalorder %s1579_s2, %s1243_s15  ;;  %p1247_p11 = scmp.lt.u32.totalorder %s1243_s15, %s1579_s2 }
  0x3b   :  { %p1249_p12 = pnand %p1247_p11, %p1244_p10 }
  0x3d   :  { %1252 = shalt.err (!%p1249_p12)
}
  0x3e   :  { %s1253_s0 = scalar_lea.vmem %s50_s30, 1536  ;;  %p1258_p0 = scmp.lt.s32.totalorder %s50_s30, %s50_s30 }
  0x3f   :  { %p1254_p13 = scmp.ne.s32.totalorder %s50_s30, %s1253_s0  ;;  %p1259_p1 = scmp.lt.s32.totalorder %s1253_s0, %s1253_s0 }
  0x41   :  { %p1260_p2 = por %p1259_p1, %p1258_p0 }
  0x43   :  { %p1261_p3 = pnand %p1260_p2, %p1254_p13 }
  0x45   :  { %1264 = shalt.err (!%p1261_p3)
}
  0x46   :  { %55 = dma.hbm_to_vmem [thread:$0]  %s1579_s2, 1536, %s50_s30, [#allocation6], %s1346_s10, %s1346_s10, %s1347_s14  }
  0x47   :  { %s1265_s27 = scalar_lea.hbm %s1582_s5, 6144 }
  0x48   :  { %p1266_p4 = scmp.ne.s32.totalorder %s1582_s5, %s1265_s27  ;;  %p1269_p5 = scmp.lt.u32.totalorder %s1265_s27, %s1582_s5 }
  0x4a   :  { %p1271_p6 = pnand %p1269_p5, %p1266_p4 }
  0x4c   :  { %1274 = shalt.err (!%p1271_p6)
}
  0x4d   :  { %s1275_s11 = scalar_lea.vmem %s76_s12, 6144  ;;  %p1280_p8 = scmp.lt.s32.totalorder %s76_s12, %s76_s12 }
  0x4e   :  { %p1276_p7 = scmp.ne.s32.totalorder %s76_s12, %s1275_s11  ;;  %p1281_p9 = scmp.lt.s32.totalorder %s1275_s11, %s1275_s11 }
  0x50   :  { %p1282_p10 = por %p1281_p9, %p1280_p8 }
  0x52   :  { %p1283_p11 = pnand %p1282_p10, %p1276_p7 }
  0x54   :  { %1286 = shalt.err (!%p1283_p11)
}
  0x55   :  { %81 = dma.hbm_to_vmem [thread:$0]  %s1582_s5, 6144, %s76_s12, [#allocation9], %s1346_s10, %s1346_s10, %s1347_s14  }
  0x56   :  { %1331 = dma.done.wait [#allocation3], 256  }
  0x57   :  { %1332 = vsyncadd [#allocation3], 4294967040 }
  0x58   :  { %1333 = dma.done.wait [#allocation6], 1792  }
  0x59   :  { %1334 = vsyncadd [#allocation6], 4294965504 }
  0x5a   :  { %1335 = dma.done.wait [#allocation9], 7680  }
  0x5b   :  { %1336 = vsyncadd [#allocation9], 4294959616  ;;  %vm117_vm0 = vcmask 261120   ;;  %v1350_v0 = vmov 0.0   ;;  %v106_v1 = vld [vmem:[#allocation7 + $0x8] sm:$0xff]  ;;  %v109_v2 = vld [vmem:[#allocation7 + $0x20] sm:$0xff] }
  0x5c   :  { %188 = vmatprep.mubr.f32.mxu0 %v1350_v0  ;;  %876 = vst.msk [vmem:[#allocation12 + $0x4] sm:$0xff] %vm117_vm0, %v1350_v0  ;;  %v105_v3 = vld [vmem:[#allocation7] sm:$0xff]  ;;  %v1045_v4 = vpack.c.bf16 %v109_v2, %v106_v1  ;;  %v108_v5 = vld [vmem:[#allocation7 + $0x18] sm:$0xff]  ;;  %v115_v7 = vld [vmem:[#allocation7 + $0x50] sm:$0xff]  ;;  %vm355_vm1 = vcmask 130048   ;;  %vm865_vm2 = vcmask 257024  }
  0x5d   :  { %v112_v6 = vld [vmem:[#allocation7 + $0x38] sm:$0xff]  ;;  %v1047_v8 = vpack.c.bf16 %v108_v5, %v105_v3  ;;  %v111_v10 = vld [vmem:[#allocation7 + $0x30] sm:$0xff]  ;;  %v114_v11 = vld [vmem:[#allocation7 + $0x48] sm:$0xff]  ;;  %s1351_s12 = smov [#allocation12]  }
  0x5e   :  { %v1049_v9 = vpack.c.bf16 %v115_v7, %v112_v6  ;;  %v1481_v12 = vld [vmem:[#allocation2] sm:$0xff]  ;;  %1046 = vmatprep.subr.bf16.mxu0 %v1045_v4  ;;  %v1051_v13 = vpack.c.bf16 %v114_v11, %v111_v10  ;;  %v1488_v14 = vld [vmem:[#allocation2 + $0x8] sm:$0xff]  ;;  %v107_v15 = vld [vmem:[#allocation7 + $0x10] sm:$0xff]  ;;  %s901_s13 = sshll.u32 %s1351_s12, 4  ;;  %s902_s13 = int_to_ptr.vmem [resolvable:$true] %s901_s13 }
  0x5f   :  { %982 = vmatprep.mubr.msk.f32.mxu1 %vm117_vm0, %v1481_v12  ;;  %1048 = vmatpush1.bf16.msra.mxu0 %v1047_v8  ;;  %v110_v16 = vld [vmem:[#allocation7 + $0x28] sm:$0xff]  ;;  %v113_v17 = vld [vmem:[#allocation7 + $0x40] sm:$0xff]  ;;  %v116_v19 = vld [vmem:[#allocation7 + $0x58] sm:$0xff]  ;;  %s1287_s1 = scalar_lea.vmem %s902_s13, 256  ;;  %p1292_p13 = scmp.lt.s32.totalorder %s902_s13, %s902_s13 }
  0x60   :  { %1050 = vmatprep.subr.bf16.mxu0 %v1049_v9  ;;  %v1053_v18 = vpack.c.bf16 %v110_v16, %v107_v15  ;;  %v1057_v20 = vpack.c.bf16 %v116_v19, %v113_v17  ;;  %v104_v26 = vld [vmem:[#allocation5 + $0x8] sm:$0xff]  ;;  %v103_v27 = vld [vmem:[#allocation5] sm:$0xff]  ;;  %v448_v39 = vld [vmem:[#allocation8 + $0x8] sm:$0xff]  ;;  %p1288_p12 = scmp.ne.s32.totalorder %s902_s13, %s1287_s1  ;;  %p1293_p0 = scmp.lt.s32.totalorder %s1287_s1, %s1287_s1 }
  0x61   :  { %v451_v40 = vld [vmem:[#allocation8 + $0x20] sm:$0xff]  ;;  %v449_v42 = vld [vmem:[#allocation8 + $0x10] sm:$0xff]  ;;  %v452_v43 = vld [vmem:[#allocation8 + $0x28] sm:$0xff] }
  0x62   :  { %1054 = vmatprep.subr.bf16.mxu1 %v1053_v18  ;;  %v1069_v41 = vpack.c.bf16 %v451_v40, %v448_v39  ;;  %v1077_v44 = vpack.c.bf16 %v452_v43, %v449_v42  ;;  %v455_v45 = vld [vmem:[#allocation8 + $0x40] sm:$0xff]  ;;  %v458_v46 = vld [vmem:[#allocation8 + $0x58] sm:$0xff]  ;;  %v651_v48 = vld [vmem:[#allocation10 + $0x10] sm:$0xff]  ;;  %p1294_p1 = por %p1293_p0, %p1292_p13 }
  0x63   :  { %1052 = vmatpush1.bf16.msra.mxu0 %v1051_v13  ;;  %1056 = vmatpush3.bf16.msra.mxu1 %v1053_v18  ;;  %v1081_v47 = vpack.c.bf16 %v458_v46, %v455_v45  ;;  %v654_v49 = vld [vmem:[#allocation10 + $0x28] sm:$0xff]  ;;  %v657_v51 = vld [vmem:[#allocation10 + $0x40] sm:$0xff]  ;;  %v660_v52 = vld [vmem:[#allocation10 + $0x58] sm:$0xff] }
  0x64   :  { %1058 = vmatprep.subr.bf16.mxu1 %v1057_v20  ;;  %v1117_v50 = vpack.c.bf16 %v654_v49, %v651_v48  ;;  %v1121_v53 = vpack.c.bf16 %v660_v52, %v657_v51  ;;  %v663_v54 = vld [vmem:[#allocation10 + $0x70] sm:$0xff]  ;;  %v666_v55 = vld [vmem:[#allocation10 + $0x88] sm:$0xff]  ;;  %v669_v57 = vld [vmem:[#allocation10 + $0xa0] sm:$0xff]  ;;  %p1295_p2 = pnand %p1294_p1, %p1288_p12 }
  0x65   :  { %v1125_v56 = vpack.c.bf16 %v666_v55, %v663_v54  ;;  %v672_v58 = vld [vmem:[#allocation10 + $0xb8] sm:$0xff]  ;;  %v675_v60 = vld [vmem:[#allocation10 + $0xd0] sm:$0xff]  ;;  %v678_v61 = vld [vmem:[#allocation10 + $0xe8] sm:$0xff] }
  0x66   :  { %919 = vmatmul.mubr.msk.f32.vlgmr.msra.gmra.mrb[0].mxu0 %vm117_vm0, %v1481_v12  ;;  %v1129_v59 = vpack.c.bf16 %v672_v58, %v669_v57  ;;  %v1133_v62 = vpack.c.bf16 %v678_v61, %v675_v60  ;;  %v681_v63 = vld [vmem:[#allocation10 + $0x100] sm:$0xff]  ;;  %v684_v1 = vld [vmem:[#allocation10 + $0x118] sm:$0xff]  ;;  %v687_v3 = vld [vmem:[#allocation10 + $0x130] sm:$0xff] }
  0x67   :  { %194 = vmatprep.mubr.f32.mxu0 %v1350_v0  ;;  %1060 = vmatpush3.bf16.msra.mxu1 %v1057_v20  ;;  %v1137_v2 = vpack.c.bf16 %v684_v1, %v681_v63  ;;  %v690_v4 = vld [vmem:[#allocation10 + $0x148] sm:$0xff]  ;;  %v693_v6 = vld [vmem:[#allocation10 + $0x160] sm:$0xff]  ;;  %v696_v7 = vld [vmem:[#allocation10 + $0x178] sm:$0xff] }
  0x68   :  { %v1141_v5 = vpack.c.bf16 %v690_v4, %v687_v3  ;;  %v1145_v8 = vpack.c.bf16 %v696_v7, %v693_v6  ;;  %v447_v15 = vld [vmem:[#allocation8] sm:$0xff]  ;;  %v450_v16 = vld [vmem:[#allocation8 + $0x18] sm:$0xff]  ;;  %v457_v18 = vld [vmem:[#allocation8 + $0x50] sm:$0xff] }
  0x69   :  { %v454_v17 = vld [vmem:[#allocation8 + $0x38] sm:$0xff]  ;;  %v1071_v20 = vpack.c.bf16 %v450_v16, %v447_v15  ;;  %v670_v48 = vld [vmem:[#allocation10 + $0xa8] sm:$0xff]  ;;  %v459_v15 = vld [vmem:[%s1581_s4] sm:$0x7] }
  0x6a   :  { %920 = vmatmul.mubr.msk.f32.gmra.mrb[2].mxu0 %vm117_vm0, %v1488_v14  ;;  %983 = vmatmul.mubr.msk.f32.vlgmr.msra.gmra.mrb[0].mxu1 %vm117_vm0, %v1488_v14  ;;  %v664_v42 = vld [vmem:[#allocation10 + $0x78] sm:$0xff]  ;;  %v674_v49 = vld [vmem:[#allocation10 + $0xc8] sm:$0xff] }
  0x6b   :  { %v668_v43 = vld [vmem:[#allocation10 + $0x98] sm:$0xff]  ;;  %v682_v60 = vld [vmem:[#allocation10 + $0x108] sm:$0xff] }
  0x6c   :  { %v676_v54 = vld [vmem:[#allocation10 + $0xd8] sm:$0xff]  ;;  %v686_v61 = vld [vmem:[#allocation10 + $0x128] sm:$0xff] }
  0x6d   :  { %v680_v55 = vld [vmem:[#allocation10 + $0xf8] sm:$0xff] }
  0x6e   :  { %v688_v3 = vld [vmem:[#allocation10 + $0x138] sm:$0xff] }
  0x6f   :  { %v692_v4 = vld [vmem:[#allocation10 + $0x158] sm:$0xff] }
 0x139   :  { %v190_v21 = vpop.f32.mrb[0].mxu0 }
 0x13a   :  { %v192_v22 = vpop.f32.mrb[1].mxu0  ;;  %989 = vmatprep.mubr.f32.mxu0 %v190_v21 }
 0x13d   :  { %v196_v23 = vpop.f32.mrb[2].mxu0  ;;  %v984_v36 = vpop.f32.mrb[0].mxu1 }
 0x13e   :  { %v198_v24 = vpop.f32.mrb[3].mxu0  ;;  %v267_v37 = vpop.f32.mrb[1].mxu1 }
 0x13f   :  { %v1061_v25 = vpack.c.bf16 %v198_v24, %v192_v22  ;;  %v1065_v38 = vpack.c.bf16 %v984_v36, %v267_v37  ;;  %v1073_v22 = vpack.c.bf16 %v457_v18, %v454_v17  ;;  %v456_v24 = vld [vmem:[#allocation8 + $0x48] sm:$0xff] }
 0x140   :  { %v658_v36 = vld [vmem:[#allocation10 + $0x48] sm:$0xff] }
 0x141   :  { %1062 = vmatprep.subr.bf16.mxu0 %v1061_v25  ;;  %1066 = vmatprep.subr.bf16.mxu1 %v1065_v38  ;;  %v662_v37 = vld [vmem:[#allocation10 + $0x68] sm:$0xff] }
 0x142   :  { %1064 = vmatpush3.bf16.xpose.msra.mxu0 %v1061_v25  ;;  %1068 = vmatpush3.bf16.msra.mxu1 %v1065_v38  ;;  %v650_v25 = vld [vmem:[#allocation10 + $0x8] sm:$0xff]  ;;  %v665_v38 = vld [vmem:[#allocation10 + $0x80] sm:$0xff] }
 0x143   :  { %1070 = vmatprep.subr.bf16.mxu1 %v1069_v41  ;;  %1078 = vmatprep.subr.bf16.mxu0 %v1077_v44  ;;  %v1093_v40 = vpack.c.bf16 %v665_v38, %v662_v37  ;;  %v661_v41 = vld [vmem:[#allocation10 + $0x60] sm:$0xff] }
 0x144   :  { %v1095_v45 = vpack.c.bf16 %v664_v42, %v661_v41 }
 0x149   :  { %990 = vmatmul.mubr.f32.vlgmr.msra.gmra.mrb[4].mxu0 %v196_v23  ;;  %v453_v23 = vld [vmem:[#allocation8 + $0x30] sm:$0xff] }
 0x14a   :  { %1007 = vmatprep.mubr.msk.f32.mxu0 %vm117_vm0, %v1481_v12  ;;  %1080 = vmatpush3.bf16.msra.mxu0 %v1077_v44  ;;  %v671_v44 = vld [vmem:[#allocation10 + $0xb0] sm:$0xff] }
 0x14b   :  { %1082 = vmatprep.subr.bf16.mxu0 %v1081_v47  ;;  %v1097_v46 = vpack.c.bf16 %v671_v44, %v668_v43 }
 0x14e   :  { %1084 = vmatpush3.bf16.msra.mxu0 %v1081_v47  ;;  %v667_v47 = vld [vmem:[#allocation10 + $0x90] sm:$0xff] }
 0x14f   :  { %1118 = vmatprep.subr.bf16.mxu0 %v1117_v50  ;;  %v1099_v51 = vpack.c.bf16 %v670_v48, %v667_v47 }
 0x151   :  { %1008 = vmatmul.mubr.msk.f32.vlgmr.msra.gmra.mrb[6].mxu0 %vm117_vm0, %v1488_v14 }
 0x152   :  { %1120 = vmatpush3.bf16.msra.mxu0 %v1117_v50  ;;  %v677_v50 = vld [vmem:[#allocation10 + $0xe0] sm:$0xff] }
 0x153   :  { %1122 = vmatprep.subr.bf16.mxu0 %v1121_v53  ;;  %v1101_v52 = vpack.c.bf16 %v677_v50, %v674_v49 }
 0x156   :  { %1124 = vmatpush3.bf16.msra.mxu0 %v1121_v53  ;;  %v673_v53 = vld [vmem:[#allocation10 + $0xc0] sm:$0xff] }
 0x157   :  { %1126 = vmatprep.subr.bf16.mxu0 %v1125_v56  ;;  %v1103_v57 = vpack.c.bf16 %v676_v54, %v673_v53 }
 0x15a   :  { %1128 = vmatpush3.bf16.msra.mxu0 %v1125_v56  ;;  %v683_v56 = vld [vmem:[#allocation10 + $0x110] sm:$0xff] }
 0x15b   :  { %1130 = vmatprep.subr.bf16.mxu0 %v1129_v59  ;;  %v1105_v58 = vpack.c.bf16 %v683_v56, %v680_v55 }
 0x15e   :  { %1132 = vmatpush3.bf16.msra.mxu0 %v1129_v59  ;;  %v679_v59 = vld [vmem:[#allocation10 + $0xf0] sm:$0xff] }
 0x15f   :  { %1134 = vmatprep.subr.bf16.mxu0 %v1133_v62  ;;  %v1107_v63 = vpack.c.bf16 %v682_v60, %v679_v59 }
 0x162   :  { %1136 = vmatpush3.bf16.msra.mxu0 %v1133_v62  ;;  %v689_v62 = vld [vmem:[#allocation10 + $0x140] sm:$0xff] }
 0x163   :  { %1138 = vmatprep.subr.bf16.mxu0 %v1137_v2  ;;  %v1109_v1 = vpack.c.bf16 %v689_v62, %v686_v61 }
 0x166   :  { %1140 = vmatpush3.bf16.msra.mxu0 %v1137_v2  ;;  %v685_v2 = vld [vmem:[#allocation10 + $0x120] sm:$0xff] }
 0x167   :  { %1142 = vmatprep.subr.bf16.mxu0 %v1141_v5  ;;  %v1111_v6 = vpack.c.bf16 %v688_v3, %v685_v2 }
 0x16a   :  { %1144 = vmatpush3.bf16.msra.mxu0 %v1141_v5  ;;  %v695_v5 = vld [vmem:[#allocation10 + $0x170] sm:$0xff] }
 0x16b   :  { %1146 = vmatprep.subr.bf16.mxu0 %v1145_v8  ;;  %v1113_v7 = vpack.c.bf16 %v695_v5, %v692_v4 }
 0x16e   :  { %1148 = vmatpush3.bf16.msra.mxu0 %v1145_v8  ;;  %v691_v8 = vld [vmem:[#allocation10 + $0x150] sm:$0xff] }
 0x21c   :  { %v991_v28 = vpop.f32.mrb[4].mxu0 }
 0x21d   :  { %v342_v29 = vpop.f32.mrb[5].mxu0  ;;  %v1496_v30 = vmul.f32 %v991_v28, %v104_v26  ;;  %v653_v26 = vld [vmem:[#allocation10 + $0x20] sm:$0xff] }
 0x21e   :  { %v1498_v31 = vmul.f32 %v342_v29, %v103_v27  ;;  %v1075_v27 = vpack.c.bf16 %v456_v24, %v453_v23  ;;  %v1085_v28 = vpack.c.bf16 %v653_v26, %v650_v25  ;;  %v649_v29 = vld [vmem:[#allocation10] sm:$0xff] }
 0x21f   :  { %v354_v34 = vmul.f32 %v1496_v30, %v1496_v30 }
 0x220   :  { %v353_v32 = vmul.f32 %v1498_v31, %v1498_v31 }
 0x221   :  { %v359_v35 = vsel %vm355_vm1, %v354_v34, 0.0 }
 0x222   :  { %v356_v33 = vsel %vm355_vm1, %v353_v32, 0.0  ;;  %v656_v32 = vld [vmem:[#allocation10 + $0x38] sm:$0xff] }
 0x223   :  { %357 = vadd.xlane.f32.xlu0 %v356_v33  ;;  %v659_v33 = vld [vmem:[#allocation10 + $0x50] sm:$0xff] }
 0x224   :  { %v1009_v18 = vpop.f32.mrb[6].mxu0 }
 0x227   :  { %360 = vadd.xlane.f32.xlu0 %v359_v35  ;;  %v655_v35 = vld [vmem:[#allocation10 + $0x30] sm:$0xff] }
 0x228   :  { %v1091_v39 = vpack.c.bf16 %v658_v36, %v655_v35 }
 0x2b0   :  { %v358_v9 = vpop.xlane.xlu0 %357 }
 0x2b1   :  { %1161 = vrsqrt.f32 %v358_v9  ;;  %v694_v9 = vld [vmem:[#allocation10 + $0x168] sm:$0xff] }
 0x2b4   :  { %v361_v10 = vpop.xlane.xlu0 %360 }
 0x2b5   :  { %1163 = vrsqrt.f32 %v361_v10  ;;  %v1115_v10 = vpack.c.bf16 %v694_v9, %v691_v8 }
 0x2bb   :  { %v1162_v11 = vpop.eup %1161 }
 0x2bc   :  { %v364_v13 = vmul.f32 %v1162_v11, %v1498_v31  ;;  %v652_v31 = vld [vmem:[#allocation10 + $0x18] sm:$0xff]  ;;  %v461_v11 = vlaneseq }
 0x2bd   :  { %v1087_v34 = vpack.c.bf16 %v652_v31, %v649_v29 }
 0x2be   :  { %996 = vmatprep.mubr.msk.f32.mxu1 %vm355_vm1, %v364_v13  ;;  %v1519_v13 = vshrl.u32 %v461_v11, 7 }
 0x2bf   :  { %v1164_v19 = vpop.eup %1163 }
 0x2c0   :  { %v365_v21 = vmul.f32 %v1164_v19, %v1496_v30  ;;  %v1089_v30 = vpack.c.bf16 %v659_v33, %v656_v32  ;;  %v467_v16 = vsub.s32 1, %v1519_v13  ;;  %v471_v17 = vsub.s32 2, %v1519_v13 }
 0x2c1   :  { %v463_v31 = vsub.s32 0, %v1519_v13 }
 0x2c2   :  { %997 = vmatmul.mubr.msk.f32.vlgmr.msra.gmra.mrb[2].mxu1 %vm355_vm1, %v365_v21  ;;  %v468_v19 = vrot.slane %v459_v15, %v467_v16  ;;  %v472_v21 = vrot.slane %v459_v15, %v471_v17 }
 0x2c3   :  { %1072 = vmatpush1.bf16.msra.mxu1 %v1071_v20  ;;  %540 = vmatprep.mubr.f32.mxu1 %v1350_v0  ;;  %v617_v20 = vpop.f32.mrb[7].mxu0  ;;  %v464_v32 = vrot.slane %v459_v15, %v463_v31 }
 0x2c4   :  { %1074 = vmatprep.subr.bf16.mxu1 %v1073_v22  ;;  %v622_v22 = vadd.f32 %v1009_v18, %v472_v21 }
 0x2c7   :  { %1076 = vmatpush1.bf16.msra.mxu1 %v1075_v27 }
 0x2c8   :  { %1086 = vmatprep.subr.bf16.mxu1 %v1085_v28 }
 0x2ca   :  { %925 = vmatmul.mubr.msk.f32.vlgmr.msra.gmra.mrb[4].mxu1 %vm117_vm0, %v1481_v12 }
 0x2cb   :  { %1088 = vmatpush1.bf16.msra.mxu1 %v1087_v34  ;;  %546 = vmatprep.mubr.f32.mxu1 %v1350_v0 }
 0x2cc   :  { %1090 = vmatprep.subr.bf16.mxu1 %v1089_v30 }
 0x2ce   :  { %926 = vmatmul.mubr.msk.f32.gmra.mrb[6].mxu1 %vm117_vm0, %v1488_v14 }
 0x2cf   :  { %1092 = vmatpush1.bf16.msra.mxu1 %v1091_v39  ;;  %778 = vmatprep.mubr.f32.mxu1 %v1350_v0 }
 0x2d0   :  { %1094 = vmatprep.subr.bf16.mxu1 %v1093_v40 }
 0x2d3   :  { %1096 = vmatpush1.bf16.msra.mxu1 %v1095_v45 }
 0x2d4   :  { %1098 = vmatprep.subr.bf16.mxu1 %v1097_v46 }
 0x2d7   :  { %1100 = vmatpush1.bf16.msra.mxu1 %v1099_v51 }
 0x2d8   :  { %1102 = vmatprep.subr.bf16.mxu1 %v1101_v52 }
 0x2db   :  { %1104 = vmatpush1.bf16.msra.mxu1 %v1103_v57 }
 0x2dc   :  { %1106 = vmatprep.subr.bf16.mxu1 %v1105_v58 }
 0x2df   :  { %1108 = vmatpush1.bf16.msra.mxu1 %v1107_v63 }
 0x2e0   :  { %1110 = vmatprep.subr.bf16.mxu1 %v1109_v1 }
 0x2e3   :  { %1112 = vmatpush1.bf16.msra.mxu1 %v1111_v6 }
 0x2e4   :  { %1114 = vmatprep.subr.bf16.mxu1 %v1113_v7 }
 0x2e7   :  { %1116 = vmatpush1.bf16.msra.mxu1 %v1115_v10 }
 0x395   :  { %v998_v23 = vpop.f32.mrb[2].mxu1 }
 0x396   :  { %v438_v24 = vpop.f32.mrb[3].mxu1 }
 0x397   :  { %779 = vmatmul.mubr.f32.vlgmr.msra.gmra.mrb[8].mxu1 %v438_v24  ;;  %1042 = vmatprep.mubr.f32.mxu0 %v438_v24 }
 0x398   :  { %1043 = vmatmul.mubr.f32.vlgmr.msra.gmra.mrb[8].mxu0 %v998_v23  ;;  %784 = vmatprep.mubr.f32.mxu1 %v1350_v0  ;;  %v935_v0 = vld [vmem:[%s1584_s7] ss:$0 sm:$0xff] }
 0x39b   :  { %785 = vmatmul.mubr.f32.gmra.mrb[10].mxu1 %v998_v23 }
 0x39d   :  { %v542_v25 = vpop.f32.mrb[4].mxu1 }
 0x39e   :  { %v544_v26 = vpop.f32.mrb[5].mxu1  ;;  %v543_v33 = vadd.f32 %v542_v25, %v464_v32 }
 0x39f   :  { %v545_v27 = vadd.f32 %v544_v26, %v468_v19 }
 0x3a0   :  { %v929_v34 = vmul.f32 -1.442695, %v543_v33 }
 0x3a1   :  { %v548_v28 = vpop.f32.mrb[6].mxu1 }
 0x3a2   :  { %v549_v29 = vpop.f32.mrb[7].mxu1  ;;  %1165 = vpow2.f32 %v929_v34 }
 0x3ac   :  { %v1166_v30 = vpop.eup %1165 }
 0x3ad   :  { %v634_v35 = vadd.f32 1.0, %v1166_v30 }
 0x3af   :  { %1167 = vrcp.f32 %v634_v35 }
 0x3b9   :  { %v1168_v36 = vpop.eup %1167 }
 0x3ba   :  { %v643_v37 = vmul.f32 2.0, %v1168_v36 }
 0x3bc   :  { %v932_v38 = vadd.f32 -1.0, %v643_v37 }
 0x3be   :  { %v874_v39 = vmul.f32 %v935_v0, %v932_v38 }
 0x3c0   :  { %875 = vst.msk [vmem:[#allocation12] sm:$0xf] %vm865_vm2, %v874_v39 }
 0x3c1   :  { %1298 = shalt.err (!%p1295_p2)
}
 0x3c2   :  { %s1299_s17 = scalar_lea.hbm %s1586_s9, 256 }
 0x3c3   :  { %p1300_p3 = scmp.ne.s32.totalorder %s1586_s9, %s1299_s17  ;;  %p1303_p4 = scmp.lt.u32.totalorder %s1299_s17, %s1586_s9 }
 0x3c5   :  { %p1305_p5 = pnand %p1303_p4, %p1300_p3 }
 0x3c7   :  { %1308 = shalt.err (!%p1305_p5)
}
 0x3c8   :  { %907 = dma.vmem_to_hbm [thread:$0]  %s902_s13, 256, %s1586_s9, [#allocation13], %s1342_s19, %s1342_s19, %s1343_s20   ;;  %v931_v40 = vmul.f32 -1.442695, %v622_v22  ;;  %v930_v41 = vmul.f32 -1.442695, %v545_v27 }
 0x3c9   :  { %v697_v47 = vld [vmem:[%s1583_s6] sm:$0x7]  ;;  %s1352_s6 = smov [#allocation11]   ;;  %vm879_vm3 = vcmask 261124  }
 0x3ca   :  { %1169 = vpow2.f32 %v931_v40  ;;  %v702_v50 = vrot.slane %v697_v47, %v463_v31  ;;  %v706_v52 = vrot.slane %v697_v47, %v467_v16  ;;  %v710_v53 = vrot.slane %v697_v47, %v471_v17  ;;  %s889_s9 = sshll.u32 %s1352_s6, 4  ;;  %s890_s9 = int_to_ptr.vmem [resolvable:$true] %s889_s9 }
 0x3cb   :  { %1171 = vpow2.f32 %v930_v41  ;;  %s1309_s27 = scalar_lea.vmem %s890_s9, 256  ;;  %p1314_p7 = scmp.lt.s32.totalorder %s890_s9, %s890_s9 }
 0x3cc   :  { %p1310_p6 = scmp.ne.s32.totalorder %s890_s9, %s1309_s27  ;;  %p1315_p8 = scmp.lt.s32.totalorder %s1309_s27, %s1309_s27 }
 0x3ce   :  { %p1316_p9 = por %p1315_p8, %p1314_p7 }
 0x3d0   :  { %p1317_p10 = pnand %p1316_p9, %p1310_p6 }
 0x3d4   :  { %v1170_v42 = vpop.eup %1169 }
 0x3d5   :  { %v1172_v43 = vpop.eup %1171  ;;  %v636_v44 = vadd.f32 1.0, %v1170_v42 }
 0x3d6   :  { %v635_v45 = vadd.f32 1.0, %v1172_v43 }
 0x3d7   :  { %1173 = vrcp.f32 %v636_v44 }
 0x3d8   :  { %1175 = vrcp.f32 %v635_v45 }
 0x3e1   :  { %v1174_v46 = vpop.eup %1173 }
 0x3e2   :  { %v1176_v48 = vpop.eup %1175  ;;  %v645_v49 = vmul.f32 2.0, %v1174_v46 }
 0x3e3   :  { %v644_v51 = vmul.f32 2.0, %v1176_v48 }
 0x3e4   :  { %v934_v55 = vadd.f32 -1.0, %v645_v49 }
 0x3e5   :  { %v933_v59 = vadd.f32 -1.0, %v644_v51 }
 0x46a   :  { %v780_v54 = vpop.f32.mrb[8].mxu1 }
 0x46b   :  { %v781_v56 = vadd.f32 %v780_v54, %v702_v50  ;;  %v782_v57 = vpop.f32.mrb[9].mxu1  ;;  %v1044_v58 = vpop.f32.mrb[8].mxu0 }
 0x46c   :  { %v783_v60 = vadd.f32 %v782_v57, %v706_v52  ;;  %v860_v61 = vadd.f32 %v1044_v58, %v710_v53  ;;  %v855_v62 = vpop.f32.mrb[9].mxu0 }
 0x46d   :  { %v863_v63 = vmul.f32 %v932_v38, %v781_v56 }
 0x46e   :  { %v877_v1 = vmul.f32 %v933_v59, %v783_v60  ;;  %v881_v2 = vmul.f32 %v934_v55, %v860_v61  ;;  %v786_v3 = vpop.f32.mrb[10].mxu1 }
 0x46f   :  { %v864_v4 = vadd.f32 %v863_v63, %v1481_v12  ;;  %v787_v5 = vpop.f32.mrb[11].mxu1 }
 0x470   :  { %v878_v6 = vadd.f32 %v877_v1, %v1481_v12  ;;  %v882_v7 = vadd.f32 %v881_v2, %v1488_v14 }
 0x471   :  { %866 = vst.msk [vmem:[#allocation11] sm:$0xf] %vm865_vm2, %v864_v4 }
 0x472   :  { %880 = vst.msk [vmem:[#allocation11] sm:$0xf0] %vm879_vm3, %v878_v6  ;;  %883 = vst.msk [vmem:[#allocation11 + $0x4] sm:$0xf0] %vm879_vm3, %v882_v7 }
 0x473   :  { %1320 = shalt.err (!%p1317_p10)
}
 0x474   :  { %s1321_s24 = scalar_lea.hbm %s1585_s8, 256 }
 0x475   :  { %p1322_p11 = scmp.ne.s32.totalorder %s1585_s8, %s1321_s24  ;;  %p1325_p12 = scmp.lt.u32.totalorder %s1321_s24, %s1585_s8 }
 0x477   :  { %p1327_p13 = pnand %p1325_p12, %p1322_p11 }
 0x479   :  { %1330 = shalt.err (!%p1327_p13)
}
 0x47a   :  { %895 = dma.vmem_to_hbm [thread:$0]  %s890_s9, 256, %s1585_s8, [#allocation4], %s1342_s19, %s1342_s19, %s1343_s20  }
 0x47b   :  { %1337 = dma.done.wait [#allocation4], 256  }
 0x47c   :  { %1338 = vsyncadd [#allocation4], 4294967040 }
 0x47d   :  { %1339 = dma.done.wait [#allocation13], 256  }
 0x47e   :  { %1340 = vsyncadd [#allocation13], 4294967040 }
 0x47f   :  { %914 = vsyncpa [#allocation3], 1 }
 0x480   :  { %915 = vsyncpa [#allocation6], 1 }
 0x481   :  { %916 = vsyncpa [#allocation9], 1 }
 0x482   :  { %917 = vsyncpa [#allocation4], 1 }
 0x483   :  { %918 = vsyncpa [#allocation13], 1 }

</bundles_post_ra>
